<compile_context>
chip_gen: v6e
topology: v6e:2x2x1
jax: 0.10.0
libtpu: 0.0.40
codegen_flags: <defaults>
</compile_context>

<pallas_src>
import functools

import jax
import jax.numpy as jnp
from jax.experimental import pallas as pl
from jax.experimental.pallas import tpu as pltpu

LANE = 128   # lane width (last dim granularity)
SUB = 8      # sublane granularity (second-to-last dim)


def _round_up(x, m):
    return (x + m - 1) // m * m


def _pad2(a, rows, cols):
    return jnp.pad(a, ((0, rows - a.shape[0]), (0, cols - a.shape[1])))


# ----------------------------------------------------------------------------
# Kernel
# ----------------------------------------------------------------------------
def _actor_fwd_kernel(x_ref, w1_ref, b1_ref, w2_ref, b2_ref, w3_ref, b3_ref,
                      o_ref, *, n_chunks, chunk_rows, fold_b1):
    """One batch tile: fused Linear(+b1 folded in W1)+ReLU, Linear+ReLU, Linear.

    x_ref is f32 (cast to bf16 in-kernel), w*_ref are bf16 (MXU-native),
    b*_ref are f32, all MXU accumulation is f32.  The tile is processed in
    `n_chunks` row chunks so MXU dots of chunk c overlap the VPU epilogue of
    chunk c-1.
    """
    w1 = w1_ref[...]
    w2 = w2_ref[...]
    w3 = w3_ref[...]
    b2 = b2_ref[...]
    b3 = b3_ref[...]
    b1 = None if fold_b1 else b1_ref[...]

    for c in range(n_chunks):                       # static unrolled chunk loop
        r = c * chunk_rows
        x = x_ref[pl.ds(r, chunk_rows), :].astype(jnp.bfloat16)
        # layer 1: Linear(input_dims -> fc1_dims) + ReLU  (b1 folded into W1)
        h1 = jnp.dot(x, w1, preferred_element_type=jnp.float32)
        if not fold_b1:
            h1 = h1 + b1
        h1 = jnp.maximum(h1.astype(jnp.bfloat16), 0)          # cast-before-ReLU
        # layer 2: Linear(fc1_dims -> fc2_dims) + ReLU
        h2 = jnp.dot(h1, w2, preferred_element_type=jnp.float32) + b2
        h2 = jnp.maximum(h2.astype(jnp.bfloat16), 0)
        # layer 3: Linear(fc2_dims -> output_dims), raw actions
        out = jnp.dot(h2, w3, preferred_element_type=jnp.float32) + b3
        o_ref[pl.ds(r, chunk_rows), :] = out.astype(o_ref.dtype)


# ----------------------------------------------------------------------------
# One-time parameter preparation (pad + cast + bias fold), done at init.
# ----------------------------------------------------------------------------
def prepare_params(raw):
    """raw: dict with f32 w1/w2/w3 of shape [in, out] and biases (out,) or (1, out).

    Returns padded, MXU-ready params: bf16 weights (dims padded to 128) with b1
    folded into row `din` of W1 when padding allows, and f32 padded biases.
    """
    w1, w2, w3 = (raw[k].astype(jnp.float32) for k in ("w1", "w2", "w3"))
    b1, b2, b3 = (jnp.reshape(raw[k], (1, -1)).astype(jnp.float32)
                  for k in ("b1", "b2", "b3"))

    din, f1 = w1.shape
    f2, dout = w2.shape[1], w3.shape[1]
    din_p, f1_p, f2_p, dout_p = (_round_up(d, LANE) for d in (din, f1, f2, dout))

    w1_p = _pad2(w1, din_p, f1_p)
    if din < din_p:
        # Fold b1 into the first padded K row; the wrapper puts 1.0 into
        # column `din` of x so the MXU adds b1 for free.
        w1_p = w1_p.at[din, :f1].set(b1[0])
    w1_p = w1_p.astype(jnp.bfloat16)
    w2_p = _pad2(w2, f1_p, f2_p).astype(jnp.bfloat16)
    w3_p = _pad2(w3, f2_p, dout_p).astype(jnp.bfloat16)
    b1_p = _pad2(b1, 1, f1_p)
    b2_p = _pad2(b2, 1, f2_p)
    b3_p = _pad2(b3, 1, dout_p)
    return dict(w1=w1_p, b1=b1_p, w2=w2_p, b2=b2_p, w3=w3_p, b3=b3_p)


# ----------------------------------------------------------------------------
# Forward wrapper
# ----------------------------------------------------------------------------
@functools.partial(jax.jit, static_argnames=("dout", "tm_max", "min_steps"))
def actor_forward(state, params, *, dout, tm_max=1024, min_steps=2):
    """state: [B, input_dims] f32.  params: output of prepare_params().
    dout: true (unpadded) number of actions."""
    w1_p, b1_p = params["w1"], params["b1"]
    w2_p, b2_p = params["w2"], params["b2"]
    w3_p, b3_p = params["w3"], params["b3"]

    B, din = state.shape
    din_p, f1_p = w1_p.shape
    f2_p, dout_p = w2_p.shape[1], w3_p.shape[1]
    fold_b1 = din < din_p                      # static: padding column exists

    # ---- balanced batch tiling ----
    bp_min = _round_up(B, SUB)
    n_steps = max(1, -(-bp_min // tm_max))
    if bp_min > 128:
        # Enough rows: use >=2 "parallel" steps so v7x's 2 TCs both get work
        # (costs ~0.35us extra on single-TC v5e/v6e; skipped for tiny batches).
        n_steps = max(n_steps, min_steps)
    rows_per_step = -(-bp_min // n_steps)
    # in-kernel row chunks so MXU dots overlap the previous chunk's VPU epilogue
    if rows_per_step >= 512:
        n_chunks = 4
    elif rows_per_step >= 128:
        n_chunks = 2
    else:
        n_chunks = 1
    tm = _round_up(rows_per_step, SUB * n_chunks)
    bp = tm * n_steps
    chunk_rows = tm // n_chunks

    # ---- per-call x padding only (f32; bf16 cast happens in-kernel) ----
    x_p = _pad2(state.astype(jnp.float32), bp, din_p)
    if fold_b1:
        x_p = x_p.at[:, din].set(1.0)          # 1.0 * (b1 row of W1) on the MXU

    kernel = functools.partial(_actor_fwd_kernel, n_chunks=n_chunks,
                               chunk_rows=chunk_rows, fold_b1=fold_b1)

    # weights/biases: constant block index across the batch grid -> VMEM resident
    resident = lambda shape: pl.BlockSpec(shape, lambda i: (0, 0))

    flops = 2 * bp * (din_p * f1_p + f1_p * f2_p + f2_p * dout_p)
    bytes_accessed = (x_p.size * 4
                      + (w1_p.size + w2_p.size + w3_p.size) * 2
                      + (b1_p.size + b2_p.size + b3_p.size) * 4
                      + bp * dout_p * 4)

    out_p = pl.pallas_call(
        kernel,
        out_shape=jax.ShapeDtypeStruct((bp, dout_p), jnp.float32),
        grid=(n_steps,),
        in_specs=[
            pl.BlockSpec((tm, din_p), lambda i: (i, 0)),   # x streams per tile
            resident(w1_p.shape), resident(b1_p.shape),
            resident(w2_p.shape), resident(b2_p.shape),
            resident(w3_p.shape), resident(b3_p.shape),
        ],
        out_specs=pl.BlockSpec((tm, dout_p), lambda i: (i, 0)),
        compiler_params=pltpu.CompilerParams(
            dimension_semantics=("parallel",),             # shard batch across TCs
        ),
        cost_estimate=pl.CostEstimate(
            flops=flops, transcendentals=0, bytes_accessed=bytes_accessed),
    )(x_p, w1_p, b1_p, w2_p, b2_p, w3_p, b3_p)

    # strip batch + lane padding
    return out_p[:B, :dout]


# ----------------------------------------------------------------------------
# Init + references
# ----------------------------------------------------------------------------
def init_params(key, input_dims, fc1_dims, fc2_dims, output_dims):
    """torch.nn.Linear-style init U(-1/sqrt(fan_in), 1/sqrt(fan_in)); weights
    stored pre-transposed to [in, out] so the kernel computes x @ W + b."""
    ks = jax.random.split(key, 6)

    def linear(kw, kb, fan_in, fan_out):
        bound = fan_in ** -0.5
        w = jax.random.uniform(kw, (fan_in, fan_out), jnp.float32, -bound, bound)
        b = jax.random.uniform(kb, (fan_out,), jnp.float32, -bound, bound)
        return w, b

    w1, b1 = linear(ks[0], ks[1], input_dims, fc1_dims)
    w2, b2 = linear(ks[2], ks[3], fc1_dims, fc2_dims)
    w3, b3 = linear(ks[4], ks[5], fc2_dims, output_dims)
    return dict(w1=w1, b1=b1, w2=w2, b2=b2, w3=w3, b3=b3)


def actor_forward_ref_f32(state, p):
    """Full-precision reference (matches the PyTorch module numerics)."""
    h1 = jnp.maximum(state @ p["w1"] + p["b1"], 0.0)
    h2 = jnp.maximum(h1 @ p["w2"] + p["b2"], 0.0)
    return h2 @ p["w3"] + p["b3"]


def actor_forward_ref_bf16(state, p, fold_b1=True):
    """Reference mimicking the kernel numerics (bf16 operands, f32 accumulate,
    b1 folded -> added at bf16 precision, cast-before-ReLU)."""
    bf = jnp.bfloat16
    x = state.astype(bf)
    b1 = p["b1"].astype(bf).astype(jnp.float32) if fold_b1 else p["b1"]
    h1 = jnp.dot(x, p["w1"].astype(bf), preferred_element_type=jnp.float32) + b1
    h1 = jnp.maximum(h1.astype(bf), 0)
    h2 = jnp.dot(h1, p["w2"].astype(bf), preferred_element_type=jnp.float32) + p["b2"]
    h2 = jnp.maximum(h2.astype(bf), 0)
    return jnp.dot(h2, p["w3"].astype(bf), preferred_element_type=jnp.float32) + p["b3"]


if __name__ == "__main__":
    # Small shapes consistent with the module: batch=8 states of input_dims=16,
    # fc1_dims=64, fc2_dims=32, output_dims=8 actions.
    B, input_dims, fc1_dims, fc2_dims, output_dims = 8, 16, 64, 32, 8

    key = jax.random.PRNGKey(0)
    k_state, k_params = jax.random.split(key)
    state = jax.random.normal(k_state, (B, input_dims), jnp.float32)
    raw_params = init_params(k_params, input_dims, fc1_dims, fc2_dims, output_dims)
    params = prepare_params(raw_params)            # one-time pad/cast/bias-fold

    actions = actor_forward(state, params, dout=output_dims)
    actions = jax.block_until_ready(actions)
    assert actions.shape == (B, output_dims)

    # Tight check against a reference with the same bf16/f32 numerics as the kernel.
    fold_b1 = (input_dims % LANE) != 0
    ref_bf16 = actor_forward_ref_bf16(state, raw_params, fold_b1=fold_b1)
    assert jnp.allclose(actions, ref_bf16, atol=1e-4, rtol=1e-4), "mismatch vs bf16 reference"

    # Loose check against the full-f32 (PyTorch-equivalent) reference.
    ref_f32 = actor_forward_ref_f32(state, raw_params)
    assert jnp.allclose(actions, ref_f32, atol=5e-2, rtol=5e-2), "mismatch vs f32 reference"

    print("KERNEL_OK")
</pallas_src>

<mosaic_0001>
module attributes {stable_mosaic.version = 11 : i64} {
  func.func @_actor_fwd_kernel(%arg0: i32, %arg1: memref<8x128xf32, #tpu.memory_space<vmem>>, %arg2: memref<128x128xbf16, #tpu.memory_space<vmem>>, %arg3: memref<1x128xf32, #tpu.memory_space<vmem>>, %arg4: memref<128x128xbf16, #tpu.memory_space<vmem>>, %arg5: memref<1x128xf32, #tpu.memory_space<vmem>>, %arg6: memref<128x128xbf16, #tpu.memory_space<vmem>>, %arg7: memref<1x128xf32, #tpu.memory_space<vmem>>, %arg8: memref<8x128xf32, #tpu.memory_space<vmem>>) attributes {dimension_semantics = [#tpu.dimension_semantics<parallel>], iteration_bounds = array<i64: 1>, scalar_prefetch = 0 : i64, scratch_operands = 0 : i64, tpu.core_type = #tpu.core_type<tc>, window_params = [{transform_indices = @transform_0, window_bounds = array<i64: 8, 128>}, {pipeline_mode = #tpu.pipeline_mode<synchronous>, transform_indices = @transform_1, window_bounds = array<i64: 128, 128>}, {pipeline_mode = #tpu.pipeline_mode<synchronous>, transform_indices = @transform_2, window_bounds = array<i64: 1, 128>}, {pipeline_mode = #tpu.pipeline_mode<synchronous>, transform_indices = @transform_3, window_bounds = array<i64: 128, 128>}, {pipeline_mode = #tpu.pipeline_mode<synchronous>, transform_indices = @transform_4, window_bounds = array<i64: 1, 128>}, {pipeline_mode = #tpu.pipeline_mode<synchronous>, transform_indices = @transform_5, window_bounds = array<i64: 128, 128>}, {pipeline_mode = #tpu.pipeline_mode<synchronous>, transform_indices = @transform_6, window_bounds = array<i64: 1, 128>}, {transform_indices = @transform_7, window_bounds = array<i64: 8, 128>}]} {
    %c0 = arith.constant 0 : index
    %c0_0 = arith.constant 0 : index
    %0 = vector.load %arg2[%c0, %c0_0] : memref<128x128xbf16, #tpu.memory_space<vmem>>, vector<128x128xbf16>
    %c0_1 = arith.constant 0 : index
    %c0_2 = arith.constant 0 : index
    %1 = vector.load %arg4[%c0_1, %c0_2] : memref<128x128xbf16, #tpu.memory_space<vmem>>, vector<128x128xbf16>
    %c0_3 = arith.constant 0 : index
    %c0_4 = arith.constant 0 : index
    %2 = vector.load %arg6[%c0_3, %c0_4] : memref<128x128xbf16, #tpu.memory_space<vmem>>, vector<128x128xbf16>
    %c0_5 = arith.constant 0 : index
    %c0_6 = arith.constant 0 : index
    %3 = vector.load %arg5[%c0_5, %c0_6] : memref<1x128xf32, #tpu.memory_space<vmem>>, vector<1x128xf32>
    %c0_7 = arith.constant 0 : index
    %c0_8 = arith.constant 0 : index
    %4 = vector.load %arg7[%c0_7, %c0_8] : memref<1x128xf32, #tpu.memory_space<vmem>>, vector<1x128xf32>
    %c0_9 = arith.constant 0 : index
    %c0_10 = arith.constant 0 : index
    %5 = vector.load %arg1[%c0_9, %c0_10] : memref<8x128xf32, #tpu.memory_space<vmem>>, vector<8x128xf32>
    %6 = arith.truncf %5 : vector<8x128xf32> to vector<8x128xbf16>
    %cst = arith.constant dense<0.000000e+00> : vector<8x128xf32>
    %7 = tpu.matmul %6, %0, %cst {dimension_numbers = #tpu.dot_dimension_numbers<[1], [0], [0], [1], [0, 0, 1, 1], [], []>} : vector<8x128xbf16>, vector<128x128xbf16>, vector<8x128xf32> -> vector<8x128xf32>
    %8 = arith.truncf %7 : vector<8x128xf32> to vector<8x128xbf16>
    %cst_11 = arith.constant 0.000000e+00 : bf16
    %9 = vector.broadcast %cst_11 : bf16 to vector<8x128xbf16>
    %10 = arith.maximumf %8, %9 : vector<8x128xbf16>
    %cst_12 = arith.constant dense<0.000000e+00> : vector<8x128xf32>
    %11 = tpu.matmul %10, %1, %cst_12 {dimension_numbers = #tpu.dot_dimension_numbers<[1], [0], [0], [1], [0, 0, 1, 1], [], []>} : vector<8x128xbf16>, vector<128x128xbf16>, vector<8x128xf32> -> vector<8x128xf32>
    %12 = vector.broadcast %3 : vector<1x128xf32> to vector<8x128xf32>
    %13 = arith.addf %11, %12 : vector<8x128xf32>
    %14 = arith.truncf %13 : vector<8x128xf32> to vector<8x128xbf16>
    %cst_13 = arith.constant 0.000000e+00 : bf16
    %15 = vector.broadcast %cst_13 : bf16 to vector<8x128xbf16>
    %16 = arith.maximumf %14, %15 : vector<8x128xbf16>
    %cst_14 = arith.constant dense<0.000000e+00> : vector<8x128xf32>
    %17 = tpu.matmul %16, %2, %cst_14 {dimension_numbers = #tpu.dot_dimension_numbers<[1], [0], [0], [1], [0, 0, 1, 1], [], []>} : vector<8x128xbf16>, vector<128x128xbf16>, vector<8x128xf32> -> vector<8x128xf32>
    %18 = vector.broadcast %4 : vector<1x128xf32> to vector<8x128xf32>
    %19 = arith.addf %17, %18 : vector<8x128xf32>
    %c0_15 = arith.constant 0 : index
    %c0_16 = arith.constant 0 : index
    %20 = vector.load %arg8[%c0_15, %c0_16] : memref<8x128xf32, #tpu.memory_space<vmem>>, vector<8x128xf32>
    tpu.vector_store %arg8[%c0_15, %c0_16], %19 {strides = array<i32>} : memref<8x128xf32, #tpu.memory_space<vmem>>, vector<8x128xf32>,
    return
  }
  func.func @transform_0(%arg0: i32) -> (i32, i32) {
    %c0_i32 = arith.constant 0 : i32
    %c0_i32_0 = arith.constant 0 : i32
    return %arg0, %c0_i32 : i32, i32
  }
  func.func @transform_1(%arg0: i32) -> (i32, i32) {
    %c0_i32 = arith.constant 0 : i32
    %c0_i32_0 = arith.constant 0 : i32
    %c0_i32_1 = arith.constant 0 : i32
    return %c0_i32, %c0_i32_0 : i32, i32
  }
  func.func @transform_2(%arg0: i32) -> (i32, i32) {
    %c0_i32 = arith.constant 0 : i32
    %c0_i32_0 = arith.constant 0 : i32
    %c0_i32_1 = arith.constant 0 : i32
    return %c0_i32, %c0_i32_0 : i32, i32
  }
  func.func @transform_3(%arg0: i32) -> (i32, i32) {
    %c0_i32 = arith.constant 0 : i32
    %c0_i32_0 = arith.constant 0 : i32
    %c0_i32_1 = arith.constant 0 : i32
    return %c0_i32, %c0_i32_0 : i32, i32
  }
  func.func @transform_4(%arg0: i32) -> (i32, i32) {
    %c0_i32 = arith.constant 0 : i32
    %c0_i32_0 = arith.constant 0 : i32
    %c0_i32_1 = arith.constant 0 : i32
    return %c0_i32, %c0_i32_0 : i32, i32
  }
  func.func @transform_5(%arg0: i32) -> (i32, i32) {
    %c0_i32 = arith.constant 0 : i32
    %c0_i32_0 = arith.constant 0 : i32
    %c0_i32_1 = arith.constant 0 : i32
    return %c0_i32, %c0_i32_0 : i32, i32
  }
  func.func @transform_6(%arg0: i32) -> (i32, i32) {
    %c0_i32 = arith.constant 0 : i32
    %c0_i32_0 = arith.constant 0 : i32
    %c0_i32_1 = arith.constant 0 : i32
    return %c0_i32, %c0_i32_0 : i32, i32
  }
  func.func @transform_7(%arg0: i32) -> (i32, i32) {
    %c0_i32 = arith.constant 0 : i32
    %c0_i32_0 = arith.constant 0 : i32
    return %arg0, %c0_i32 : i32, i32
  }
}

</mosaic_0001>

<bundles_post_ra>
// kernel: actor_forward.1
= control target key start
LH: loop header
LB: loop body
LE: loop exit
PB: predicated region body
PF: predicated region fallthrough
CT: control target
= control target key end

     0   :  { %12 = vsyncpa [#allocation3], 0  ;;  %s750_s0 = inlined_call_operand.vmem [shape: f32[8,128], index: 0, kind: input, shape index: {}]   ;;  %s751_s1 = inlined_call_operand.hbm [shape: bf16[128,128], index: 1, kind: input, shape index: {}]   ;;  %s752_s2 = inlined_call_operand.vmem [shape: f32[1,128], index: 2, kind: input, shape index: {}]   ;;  %s753_s3 = inlined_call_operand.hbm [shape: bf16[128,128], index: 3, kind: input, shape index: {}]   ;;  %s754_s4 = inlined_call_operand.vmem [shape: f32[1,128], index: 4, kind: input, shape index: {}]   ;;  %s755_s5 = inlined_call_operand.hbm [shape: bf16[128,128], index: 5, kind: input, shape index: {}]   ;;  %s756_s6 = inlined_call_operand.vmem [shape: f32[1,128], index: 6, kind: input, shape index: {}]   ;;  %s757_s7 = inlined_call_operand.hbm [shape: f32[8,128], index: 7, kind: output, shape index: {}]  }
   0x1   :  { %13 = vsyncpa [#allocation6], 0 }
   0x2   :  { %14 = vsyncpa [#allocation4], 0  ;;  %s650_s24 = smov [#allocation5]   ;;  %s651_s25 = smov [#allocation2]  }
   0x3   :  { %s36_s2 = sshll.u32 %s650_s24, 4  ;;  %s22_s26 = sshll.u32 %s651_s25, 4  ;;  %s37_s2 = int_to_ptr.vmem [resolvable:$true] %s36_s2  ;;  %s23_s26 = int_to_ptr.vmem [resolvable:$true] %s22_s26 }
   0x4   :  { %s572_s27 = scalar_lea.vmem %s37_s2, 1024  ;;  %p577_p1 = scmp.lt.s32.totalorder %s37_s2, %s37_s2 }
   0x5   :  { %p573_p0 = scmp.ne.s32.totalorder %s37_s2, %s572_s27  ;;  %p578_p2 = scmp.lt.s32.totalorder %s572_s27, %s572_s27 }
   0x7   :  { %p579_p3 = por %p578_p2, %p577_p1 }
   0x9   :  { %p580_p4 = pnand %p579_p3, %p573_p0 }
   0xb   :  { %583 = shalt.err (!%p580_p4)
}
   0xc   :  { %s652_s28 = smov 64   ;;  %s653_s29 = smov 4  }
   0xd   :  { %42 = dma.hbm_to_vmem [thread:$0]  %s753_s3, 1024, %s37_s2, [#allocation6], %s652_s28, %s652_s28, %s653_s29  }
   0xe   :  { %s592_s9 = scalar_lea.vmem %s23_s26, 1024  ;;  %p597_p6 = scmp.lt.s32.totalorder %s23_s26, %s23_s26 }
   0xf   :  { %p593_p5 = scmp.ne.s32.totalorder %s23_s26, %s592_s9  ;;  %p598_p7 = scmp.lt.s32.totalorder %s592_s9, %s592_s9 }
  0x11   :  { %p599_p8 = por %p598_p7, %p597_p6 }
  0x13   :  { %p600_p9 = pnand %p599_p8, %p593_p5 }
  0x15   :  { %603 = shalt.err (!%p600_p9)
}
  0x16   :  { %28 = dma.hbm_to_vmem [thread:$0]  %s751_s1, 1024, %s23_s26, [#allocation3], %s652_s28, %s652_s28, %s653_s29  }
  0x17   :  { %s654_s12 = smov [#allocation7]  }
  0x18   :  { %s50_s13 = sshll.u32 %s654_s12, 4  ;;  %s51_s13 = int_to_ptr.vmem [resolvable:$true] %s50_s13 }
  0x19   :  { %s612_s14 = scalar_lea.vmem %s51_s13, 1024  ;;  %p617_p11 = scmp.lt.s32.totalorder %s51_s13, %s51_s13 }
  0x1a   :  { %p613_p10 = scmp.ne.s32.totalorder %s51_s13, %s612_s14  ;;  %p618_p12 = scmp.lt.s32.totalorder %s612_s14, %s612_s14 }
  0x1c   :  { %p619_p13 = por %p618_p12, %p617_p11 }
  0x1e   :  { %p620_p0 = pnand %p619_p13, %p613_p10 }
  0x20   :  { %623 = shalt.err (!%p620_p0)
}
  0x21   :  { %56 = dma.hbm_to_vmem [thread:$0]  %s755_s5, 1024, %s51_s13, [#allocation6], %s652_s28, %s652_s28, %s653_s29  }
  0x22   :  { %644 = dma.done.wait [#allocation3], 1024  }
  0x23   :  { %645 = vsyncadd [#allocation3], 4294966272 }
  0x24   :  { %646 = dma.done.wait [#allocation6], 2048  }
  0x25   :  { %647 = vsyncadd [#allocation6], 4294965248  ;;  %v655_v0 = vmov 0.0   ;;  %vm656_vm0 = vmmov 0   ;;  %v540_v1 = vld [vmem:[#allocation2 + $0x38] sm:$0xff]   ;;  %v541_v2 = vld [vmem:[#allocation2 + $0x30] sm:$0xff]  }
  0x26   :  { %471 = vmatprep.subr.bf16.mxu0 %v655_v0  ;;  %487 = vmatprep.mubr.msk.bf16.mxu0 %vm656_vm0, %v655_v0  ;;  %v542_v3 = vld [vmem:[#allocation2 + $0x28] sm:$0xff]   ;;  %v548_v4 = vld [vmem:[#allocation5 + $0x38] sm:$0xff]   ;;  %v543_v5 = vld [vmem:[#allocation2 + $0x20] sm:$0xff]   ;;  %v657_v28 = vmov 0   ;;  %s658_s19 = smov [#allocation8]  }
  0x27   :  { %491 = vmatprep.subr.bf16.mxu1 %v655_v0  ;;  %507 = vmatprep.mubr.msk.bf16.mxu1 %vm656_vm0, %v655_v0  ;;  %v549_v6 = vld [vmem:[#allocation5 + $0x30] sm:$0xff]   ;;  %v544_v7 = vld [vmem:[#allocation2 + $0x18] sm:$0xff]   ;;  %v550_v8 = vld [vmem:[#allocation5 + $0x28] sm:$0xff]   ;;  %s408_s20 = sshll.u32 %s658_s19, 4  ;;  %s409_s20 = int_to_ptr.vmem [resolvable:$true] %s408_s20 }
  0x28   :  { %472 = vmatpush3.bf16.msra.mxu0 %v540_v1  ;;  %492 = vmatpush3.bf16.msra.mxu1 %v548_v4  ;;  %v545_v9 = vld [vmem:[#allocation2 + $0x10] sm:$0xff]   ;;  %v551_v10 = vld [vmem:[#allocation5 + $0x20] sm:$0xff]   ;;  %v546_v11 = vld [vmem:[#allocation2 + $0x8] sm:$0xff]   ;;  %p629_p2 = scmp.lt.s32.totalorder %s409_s20, %s409_s20 }
  0x29   :  { %473 = vmatprep.subr.bf16.mxu0 %v655_v0  ;;  %493 = vmatprep.subr.bf16.mxu1 %v655_v0  ;;  %v552_v12 = vld [vmem:[#allocation5 + $0x18] sm:$0xff]   ;;  %v547_v13 = vld [vmem:[#allocation2] sm:$0xff]   ;;  %v553_v15 = vld [vmem:[#allocation5 + $0x10] sm:$0xff]  }
  0x2a   :  { %v119_v14 = vld [vmem:[%s750_s0] sm:$0xff]  ;;  %v554_v17 = vld [vmem:[#allocation5 + $0x8] sm:$0xff]   ;;  %v556_v19 = vld [vmem:[#allocation7 + $0x38] sm:$0xff]  }
  0x2b   :  { %v120_v16 = vpack.c.bf16 %v119_v14, %v119_v14  ;;  %v555_v18 = vld [vmem:[#allocation5] sm:$0xff]   ;;  %v557_v20 = vld [vmem:[#allocation7 + $0x30] sm:$0xff]   ;;  %v558_v21 = vld [vmem:[#allocation7 + $0x28] sm:$0xff]  }
  0x2c   :  { %474 = vmatpush3.bf16.msra.mxu0 %v541_v2  ;;  %494 = vmatpush3.bf16.msra.mxu1 %v549_v6  ;;  %v559_v22 = vld [vmem:[#allocation7 + $0x20] sm:$0xff]   ;;  %v560_v23 = vld [vmem:[#allocation7 + $0x18] sm:$0xff]   ;;  %v561_v24 = vld [vmem:[#allocation7 + $0x10] sm:$0xff]  }
  0x2d   :  { %475 = vmatprep.subr.bf16.mxu0 %v655_v0  ;;  %495 = vmatprep.subr.bf16.mxu1 %v655_v0  ;;  %v562_v32 = vld [vmem:[#allocation7 + $0x8] sm:$0xff]   ;;  %v563_v33 = vld [vmem:[#allocation7] sm:$0xff]  }
  0x2e   :  { %v426_v34 = vld [vmem:[%s754_s4] ss:$0 sm:$0xff]  ;;  %s624_s4 = scalar_lea.vmem %s409_s20, 128 }
  0x2f   :  { %v435_v42 = vld [vmem:[%s756_s6] ss:$0 sm:$0xff]  ;;  %p625_p1 = scmp.ne.s32.totalorder %s409_s20, %s624_s4  ;;  %p630_p3 = scmp.lt.s32.totalorder %s624_s4, %s624_s4 }
  0x30   :  { %476 = vmatpush3.bf16.msra.mxu0 %v542_v3  ;;  %496 = vmatpush3.bf16.msra.mxu1 %v550_v8 }
  0x31   :  { %477 = vmatprep.subr.bf16.mxu0 %v655_v0  ;;  %497 = vmatprep.subr.bf16.mxu1 %v655_v0  ;;  %p631_p4 = por %p630_p3, %p629_p2 }
  0x33   :  { %p632_p5 = pnand %p631_p4, %p625_p1 }
  0x34   :  { %478 = vmatpush3.bf16.msra.mxu0 %v543_v5  ;;  %498 = vmatpush3.bf16.msra.mxu1 %v551_v10 }
  0x35   :  { %479 = vmatprep.subr.bf16.mxu0 %v655_v0  ;;  %499 = vmatprep.subr.bf16.mxu1 %v655_v0 }
  0x38   :  { %480 = vmatpush3.bf16.msra.mxu0 %v544_v7  ;;  %500 = vmatpush3.bf16.msra.mxu1 %v552_v12 }
  0x39   :  { %481 = vmatprep.subr.bf16.mxu0 %v655_v0  ;;  %501 = vmatprep.subr.bf16.mxu1 %v655_v0 }
  0x3c   :  { %482 = vmatpush3.bf16.msra.mxu0 %v545_v9  ;;  %502 = vmatpush3.bf16.msra.mxu1 %v553_v15 }
  0x3d   :  { %483 = vmatprep.subr.bf16.mxu0 %v655_v0  ;;  %503 = vmatprep.subr.bf16.mxu1 %v655_v0 }
  0x40   :  { %484 = vmatpush3.bf16.msra.mxu0 %v546_v11  ;;  %504 = vmatpush3.bf16.msra.mxu1 %v554_v17 }
  0x41   :  { %485 = vmatprep.subr.bf16.mxu0 %v655_v0  ;;  %505 = vmatprep.subr.bf16.mxu1 %v655_v0 }
  0x44   :  { %486 = vmatpush3.bf16.msra.mxu0 %v547_v13  ;;  %506 = vmatpush3.bf16.msra.mxu1 %v555_v18 }
  0x45   :  { %511 = vmatprep.subr.bf16.mxu0 %v655_v0 }
  0x47   :  { %488 = vmatmul.mubr.bf16.vlgmr.msra.gmra.mxu0 %v120_v16 }
  0x48   :  { %527 = vmatprep.mubr.msk.bf16.mxu0 %vm656_vm0, %v655_v0  ;;  %512 = vmatpush3.bf16.msra.mxu0 %v556_v19 }
  0x49   :  { %513 = vmatprep.subr.bf16.mxu0 %v655_v0 }
  0x4c   :  { %514 = vmatpush3.bf16.msra.mxu0 %v557_v20 }
  0x4d   :  { %515 = vmatprep.subr.bf16.mxu0 %v655_v0 }
  0x50   :  { %516 = vmatpush3.bf16.msra.mxu0 %v558_v21 }
  0x51   :  { %517 = vmatprep.subr.bf16.mxu0 %v655_v0 }
  0x54   :  { %518 = vmatpush3.bf16.msra.mxu0 %v559_v22 }
  0x55   :  { %519 = vmatprep.subr.bf16.mxu0 %v655_v0 }
  0x58   :  { %520 = vmatpush3.bf16.msra.mxu0 %v560_v23 }
  0x59   :  { %521 = vmatprep.subr.bf16.mxu0 %v655_v0 }
  0x5c   :  { %522 = vmatpush3.bf16.msra.mxu0 %v561_v24 }
  0x5d   :  { %523 = vmatprep.subr.bf16.mxu0 %v655_v0 }
  0x60   :  { %524 = vmatpush3.bf16.msra.mxu0 %v562_v32 }
  0x61   :  { %525 = vmatprep.subr.bf16.mxu0 %v655_v0 }
  0x64   :  { %526 = vmatpush3.bf16.msra.mxu0 %v563_v33 }
 0x107   :  { %v203_v25 = vpop.f32.mrf.mxu0 }
 0x108   :  { %v209_v26 = vpack.c.bf16 %v203_v25, %v203_v25 }
 0x109   :  { %v489_v27 = vpop.f32.mrf.mxu0 }
 0x10a   :  { %v210_v29 = vmax.bf16 %v657_v28, %v209_v26 }
 0x10b   :  { %v206_v30 = vpop.f32.mrf.mxu0 }
 0x10c   :  { %508 = vmatmul.mubr.bf16.vlgmr.msra.gmra.mxu1 %v210_v29 }
 0x10d   :  { %v490_v31 = vpop.f32.mrf.mxu0 }
 0x1cc   :  { %v299_v35 = vpop.f32.mrf.mxu1 }
 0x1cd   :  { %v300_v36 = vadd.f32 %v426_v34, %v299_v35 }
 0x1ce   :  { %v509_v37 = vpop.f32.mrf.mxu1 }
 0x1cf   :  { %v305_v38 = vpack.c.bf16 %v300_v36, %v300_v36 }
 0x1d0   :  { %v302_v39 = vpop.f32.mrf.mxu1 }
 0x1d1   :  { %v306_v40 = vmax.bf16 %v657_v28, %v305_v38 }
 0x1d2   :  { %v510_v41 = vpop.f32.mrf.mxu1 }
 0x1d3   :  { %528 = vmatmul.mubr.bf16.vlgmr.msra.gmra.mxu0 %v306_v40 }
 0x293   :  { %v395_v43 = vpop.f32.mrf.mxu0 }
 0x294   :  { %v396_v44 = vadd.f32 %v435_v42, %v395_v43 }
 0x295   :  { %v529_v45 = vpop.f32.mrf.mxu0 }
 0x296   :  { %401 = vst [vmem:[#allocation8] sm:$0xff] %v396_v44 }
 0x297   :  { %v398_v46 = vpop.f32.mrf.mxu0 }
 0x298   :  { %635 = shalt.err (!%p632_p5)
}
 0x299   :  { %411 = dma.vmem_to_hbm [thread:$0]  %s409_s20, 128, %s757_s7, [#allocation4]   ;;  %v530_v47 = vpop.f32.mrf.mxu0 }
 0x29a   :  { %648 = dma.done.wait [#allocation4], 128  }
 0x29b   :  { %649 = vsyncadd [#allocation4], 4294967168 }
 0x29c   :  { %415 = vsyncpa [#allocation3], 1 }
 0x29d   :  { %416 = vsyncpa [#allocation6], 1 }
 0x29e   :  { %417 = vsyncpa [#allocation4], 1 }

</bundles_post_ra>
